<compile_context>
chip_gen: v5e
topology: v5e:2x2
jax: 0.10.0
libtpu: 0.0.40
codegen_flags: <defaults>
</compile_context>

<pallas_src>
import math
from functools import partial

import jax
import jax.numpy as jnp
from jax.experimental import pallas as pl
from jax.experimental.pallas import tpu as pltpu

_LANES = 128                      # vreg lane width; stored last dim is exactly lane-dense
_MAX_TILE_BYTES = 4 * 1024 * 1024  # ~4 MiB per tile (review: 1-4 MiB tiles reach ~86%+ of HBM roofline)


def _drop_path_kernel_f32(keep_ref, x_ref, o_ref, *, inv_keep_prob):
    # keep_ref: (B,) int32 in SMEM (scalar prefetch); 0 = drop sample, 1 = keep it.
    b = pl.program_id(0)
    scale = keep_ref[b].astype(jnp.float32) * inv_keep_prob        # 0.0 or 1/keep_prob
    o_ref[...] = (x_ref[...].astype(jnp.float32) * scale).astype(o_ref.dtype)


def _drop_path_kernel_native(keep_ref, x_ref, o_ref, *, inv_keep_prob):
    # Native narrow-dtype multiply (bf16/f16 on v6e/v7x): no f32 round trip, half the
    # vreg traffic.  Scale is rounded once to the input dtype (<= 1 ulp difference).
    b = pl.program_id(0)
    scale = (keep_ref[b].astype(jnp.float32) * inv_keep_prob).astype(x_ref.dtype)
    o_ref[...] = x_ref[...] * scale


def _round_up(v, m):
    return ((v + m - 1) // m) * m


def _is_pre_v6_chip():
    """True on v5e and older (no native bf16 VPU) -> keep the f32 compute path there."""
    try:
        kind = jax.devices()[0].device_kind.lower()
        return any(tag in kind for tag in ("v2", "v3", "v4", "v5"))
    except Exception:
        return True  # conservative default: f32 compute path is always correct


def _pick_row_tile(rows, batch, itemsize):
    """Row-tile (sublane) count: as large as the 4 MiB cap allows, multiple of 8,
    with >= 2 total grid blocks when batch == 1 (keep both v7x TensorCores busy)."""
    max_rows = max(8, _MAX_TILE_BYTES // (_LANES * itemsize))
    want_row_blocks = 2 if batch == 1 else 1
    tr = min(max_rows, pl.cdiv(rows, want_row_blocks))
    tr = _round_up(tr, 8)
    if tr >= rows:
        return rows               # single row block == full dim (always a legal block shape)
    return tr                     # ragged last block handled by Pallas (grid uses cdiv)


def drop_path_forward(x, keep_mask, keep_prob, scale_by_keep=True):
    """Apply per-sample DropPath scaling with a Pallas kernel.

    x: (B, ...) array.  keep_mask: (B,) int32 of 0/1 (already drawn).  keep_prob: float.
    """
    B = x.shape[0]
    M = math.prod(x.shape[1:])
    itemsize = jnp.dtype(x.dtype).itemsize

    xf = x.reshape(B, M)
    Mp = _round_up(M, _LANES)
    if Mp != M:
        # Minimal pad (to the next 128 multiple only); see TODO at top of file.
        xf = jnp.pad(xf, ((0, 0), (0, Mp - M)))
    rows = Mp // _LANES
    x3 = xf.reshape(B, rows, _LANES)              # lane-dense layout for the kernel

    tr = _pick_row_tile(rows, B, itemsize)
    tile_bytes = tr * _LANES * itemsize
    # double-buffered input + output tiles (+ headroom); explicit so v5e's 16 MiB scoped
    # default never forces small tiles, and still well under v7x's 64 MiB physical VMEM.
    vmem_limit = int(min(56 * 2**20, max(32 * 2**20, 4 * tile_bytes + 8 * 2**20)))

    inv_keep = 1.0 / keep_prob if (keep_prob > 0.0 and scale_by_keep) else 1.0
    use_native = (x.dtype != jnp.float32) and (not _is_pre_v6_chip())
    body = _drop_path_kernel_native if use_native else _drop_path_kernel_f32
    kernel = partial(body, inv_keep_prob=float(inv_keep))

    out3 = pl.pallas_call(
        kernel,
        out_shape=jax.ShapeDtypeStruct((B, rows, _LANES), x.dtype),
        grid_spec=pltpu.PrefetchScalarGridSpec(
            num_scalar_prefetch=1,                            # keep_mask -> SMEM
            grid=(B, pl.cdiv(rows, tr)),
            in_specs=[pl.BlockSpec((1, tr, _LANES), lambda b, r, keep: (b, r, 0))],
            out_specs=pl.BlockSpec((1, tr, _LANES), lambda b, r, keep: (b, r, 0)),
        ),
        compiler_params=pltpu.CompilerParams(
            dimension_semantics=("parallel", "parallel"),
            vmem_limit_bytes=vmem_limit),
    )(keep_mask, x3)

    out = out3.reshape(B, Mp)
    if Mp != M:
        out = out[:, :M]
    return out.reshape(x.shape)


def drop_path(x, key, drop_prob=0.0, training=False, scale_by_keep=True):
    """Full DropPath semantics matching the PyTorch module (identity early returns included)."""
    if drop_prob == 0.0 or not training:
        return x
    keep_prob = 1.0 - drop_prob
    keep_mask = jax.random.bernoulli(key, p=keep_prob, shape=(x.shape[0],)).astype(jnp.int32)
    return drop_path_forward(x, keep_mask, keep_prob, scale_by_keep)


def ref_drop_path(x, keep_mask, keep_prob, scale_by_keep=True):
    """Pure-JAX reference mirroring the PyTorch forward (same mask / same scale constant)."""
    inv_keep = 1.0 / keep_prob if (keep_prob > 0.0 and scale_by_keep) else 1.0
    bshape = (x.shape[0],) + (1,) * (x.ndim - 1)
    scale = keep_mask.astype(jnp.float32) * inv_keep
    return (x.astype(jnp.float32) * scale.reshape(bshape)).astype(x.dtype)


if __name__ == "__main__":
    drop_prob = 0.25
    keep_prob = 1.0 - drop_prob
    key = jax.random.PRNGKey(0)

    # --- main case: (2, 4, 16, 16) f32, M = 1024 (lane-dense, no padding) ---
    kx, km, kx2, km2 = jax.random.split(key, 4)
    x = jax.random.normal(kx, (2, 4, 16, 16), jnp.float32)
    keep_mask = jax.random.bernoulli(km, p=keep_prob, shape=(2,)).astype(jnp.int32)

    out = drop_path_forward(x, keep_mask, keep_prob, scale_by_keep=True)
    out = jax.block_until_ready(out)
    ref = ref_drop_path(x, keep_mask, keep_prob, scale_by_keep=True)
    assert out.shape == x.shape
    assert jnp.allclose(out, ref, atol=1e-6, rtol=1e-6), "f32 mismatch vs pure-JAX reference"

    # --- secondary case: B=1, bf16, M not a multiple of 128 (ragged / padded tail path,
    #     and >=2 row blocks so both v7x TensorCores get work) ---
    x2 = jax.random.normal(kx2, (1, 3, 40, 40), jnp.float32).astype(jnp.bfloat16)
    keep_mask2 = jax.random.bernoulli(km2, p=keep_prob, shape=(1,)).astype(jnp.int32)
    out2 = jax.block_until_ready(drop_path_forward(x2, keep_mask2, keep_prob, True))
    ref2 = ref_drop_path(x2, keep_mask2, keep_prob, True)
    assert out2.shape == x2.shape
    assert jnp.allclose(out2.astype(jnp.float32), ref2.astype(jnp.float32),
                        atol=1e-2, rtol=1e-2), "bf16 mismatch vs pure-JAX reference"

    # Identity paths match the PyTorch early return exactly (no kernel launch).
    assert drop_path(x, km, drop_prob=0.0, training=True) is x
    assert drop_path(x, km, drop_prob=drop_prob, training=False) is x

    print("KERNEL_OK")
</pallas_src>

<mosaic_0001>
module attributes {stable_mosaic.version = 11 : i64} {
  func.func @_drop_path_kernel_f32(%arg0: i32, %arg1: i32, %arg2: memref<2xi32, #tpu.memory_space<smem>>, %arg3: memref<1x8x128xf32, #tpu.memory_space<vmem>>, %arg4: memref<1x8x128xf32, #tpu.memory_space<vmem>>) attributes {dimension_semantics = [#tpu.dimension_semantics<parallel>, #tpu.dimension_semantics<parallel>], iteration_bounds = array<i64: 2, 1>, scalar_prefetch = 1 : i64, scratch_operands = 0 : i64, tpu.core_type = #tpu.core_type<tc>, window_params = [{transform_indices = @transform_0, window_bounds = array<i64: 1, 8, 128>}, {transform_indices = @transform_1, window_bounds = array<i64: 1, 8, 128>}]} {
    %0 = arith.index_cast %arg0 : i32 to index
    %1 = memref.load %arg2[%0] : memref<2xi32, #tpu.memory_space<smem>>
    %2 = arith.sitofp %1 : i32 to f32
    %cst = arith.constant 1.33333337 : f32
    %3 = arith.mulf %2, %cst : f32
    %c0 = arith.constant 0 : index
    %c0_0 = arith.constant 0 : index
    %c0_1 = arith.constant 0 : index
    %4 = vector.load %arg3[%c0, %c0_0, %c0_1] : memref<1x8x128xf32, #tpu.memory_space<vmem>>, vector<1x8x128xf32>
    %5 = vector.broadcast %3 : f32 to vector<1x8x128xf32>
    %6 = arith.mulf %4, %5 : vector<1x8x128xf32>
    %c0_2 = arith.constant 0 : index
    %c0_3 = arith.constant 0 : index
    %c0_4 = arith.constant 0 : index
    %7 = vector.load %arg4[%c0_2, %c0_3, %c0_4] : memref<1x8x128xf32, #tpu.memory_space<vmem>>, vector<1x8x128xf32>
    tpu.vector_store %arg4[%c0_2, %c0_3, %c0_4], %6 {strides = array<i32>} : memref<1x8x128xf32, #tpu.memory_space<vmem>>, vector<1x8x128xf32>,
    return
  }
  func.func @transform_0(%arg0: i32, %arg1: i32, %arg2: memref<2xi32, #tpu.memory_space<smem>>) -> (i32, i32, i32) {
    %c0_i32 = arith.constant 0 : i32
    %c0_i32_0 = arith.constant 0 : i32
    return %arg0, %arg1, %c0_i32 : i32, i32, i32
  }
  func.func @transform_1(%arg0: i32, %arg1: i32, %arg2: memref<2xi32, #tpu.memory_space<smem>>) -> (i32, i32, i32) {
    %c0_i32 = arith.constant 0 : i32
    %c0_i32_0 = arith.constant 0 : i32
    return %arg0, %arg1, %c0_i32 : i32, i32, i32
  }
}

</mosaic_0001>

<bundles_post_ra>
// kernel: tpu_custom_call.1
= control target key start
LH: loop header
LB: loop body
LE: loop exit
PB: predicated region body
PF: predicated region fallthrough
CT: control target
= control target key end

     0   :  { %s468_s12 = smov [#allocation3]   ;;  %s608_s0 = inlined_call_operand.hbm [shape: s32[2], index: 0, kind: input, shape index: {}]   ;;  %s609_s1 = inlined_call_operand.hbm [shape: f32[2,8,128], index: 1, kind: input, shape index: {}]   ;;  %s610_s2 = inlined_call_operand.hbm [shape: f32[2,8,128], index: 2, kind: output, shape index: {}]  }
   0x1   :  { %s8_s11 = sshll.u32 %s608_s0, 4  ;;  %s9_s11 = int_to_ptr.hbm [resolvable:$true] %s8_s11 }
   0x2   :  { %11 = dma.hbm_to_smem %s9_s11, 16, %s468_s12, [#allocation2] }
   0x3   :  { %434 = dma.done.wait [#allocation2], 16 }
   0x4   :  { %435 = vsyncadd [#allocation2], 4294967280 }
   0x5   :  { %14 = sfence }
   0x6   :  { %15 = vsyncpa [#allocation5], 0 }
   0x7   :  { %17 = vsyncpa [#allocation5 + $0x1], 0 }
   0x8   :  { %18 = vsyncpa [#allocation6], 0 }
   0x9   :  { %20 = vsyncpa [#allocation6 + $0x1], 0  ;;  %s487_s13 = smov 0   ;;  %s489_s14 = smov 0  }
   0xa   :  { %s491_s15 = smov 0   ;;  %s493_s16 = smov 0  }
   0xb   :  { %s495_s17 = smov 0   ;;  %s497_s0 = smov 0  }
   0xc LB: > { %s264_s18 = sadd.s32 4294967295, %s466_s0   ;;  %s265_s19 = sadd.s32 4294967294, %s466_s0   ;;  %s466_s0 = sphi %s497_s0, %s26_s0   ;;  %s462_s17 = sphi %s495_s17, %s619_s17   ;;  %s458_s16 = sphi %s493_s16, %s618_s16   ;;  %s454_s15 = sphi %s491_s15, %s617_s15   ;;  %s450_s14 = sphi %s489_s14, %s616_s14   ;;  %s446_s13 = sphi %s487_s13, %s615_s13  }
   0xd   : > { %s38_s20 = sadd.s32 1, %s462_s17  ;;  %s47_s21 = sadd.s32 1, %s454_s15 }
   0xe   : > { %p40_p0 = scmp.ge.s32.totalorder %s38_s20, 2  ;;  %p54_p1 = scmp.ne.s32.totalorder %s454_s15, %s450_s14 }
   0xf   : > { %p55_p2 = scmp.eq.s32.totalorder %s466_s0, 0  ;;  %p60_p3 = scmp.ne.s32.totalorder %s450_s14, %s446_s13 }
  0x10   : > { %s621_s20 = smov (%p40_p0, %s38_s20), 0  ;;  %p61_p5 = scmp.eq.s32.totalorder %s264_s18, 0 }
  0x11   : > { %p528_p4 = por %p55_p2, %p54_p1  ;;  %s42_s23 = ssub.s32 %s462_s17, %s621_s20 }
  0x12   : > { %p86_p6 = scmp.eq.s32.totalorder %s264_s18, 1  ;;  %p45_p7 = scmp.eq.s32.totalorder %s42_s23, 0 }
  0x13   : > { %p534_p8 = por %p61_p5, %p60_p3  ;;  %p92_p10 = scmp.eq.s32.totalorder %s265_s19, 1 }
  0x14   : > { %p538_p9 = por %p86_p6, %p54_p1  ;;  %p267_p12 = scmp.ge.s32.totalorder %s466_s0, 2 }
  0x15   : > { %s543_s26 = scalar_select %p45_p7, %s454_s15, %s47_s21  }
  0x16   : > { %p545_p11 = por %p92_p10, %p60_p3  ;;  %p289_p13 = scmp.lt.s32.totalorder %s466_s0, 2 }
  0x17   : > { %s112_s28 = sand.u32 1, %s454_s15   ;;  %s269_s30 = sshll.u32 %s462_s17, 3 }
  0x18   : > { %s268_s29 = sshll.u32 %s112_s28, 3  ;;  %s121_s5 = scalar_lea.hbm %s609_s1, %s269_s30 }
  0x19   : > { %s116_s6 = scalar_lea.vmem [#allocation4], %s268_s29  ;;  %s123_s8 = sshll.u32 %s121_s5, 4  ;;  %s124_s8 = int_to_ptr.hbm [resolvable:$true] %s123_s8 }
  0x1a   : > { %s125_s7 = sshll.u32 %s116_s6, 4  ;;  %p282_p0 = pnand %p289_p13, %p528_p4  ;;  %s126_s7 = int_to_ptr.vmem [resolvable:$true] %s125_s7 }
  0x1b   : > { %p270_p1 = scmp.ge.s32.totalorder %s466_s0, 1  ;;  %p130_p2 = scmp.lt.s32.totalorder %s466_s0, 3 }
  0x1c   : > { %s113_s9 = scalar_lea.sflag [#allocation5], %s112_s28 }
  0x1d   : > { %284 = dma.hbm_to_vmem [thread:$0]  (!%p282_p0), %s124_s8, 128, %s126_s7, %s113_s9  }
  0x1e   : > { %p131_p3 = pnand %p270_p1, %p130_p2 }
  0x1f   : > { %s561_s10 = sand.u32 (!%p131_p3), 1, %s450_s14  }
  0x20   : > { %134 = sbr.rel (%p131_p3) target bundleno = 54 (0x36), region = 24  ;;  %s271_s11 = sshll.u32 (!%p131_p3), %s561_s10, 3 }
  0x21   : > { %s137_s12 = scalar_lea.sflag (!%p131_p3), [#allocation5], %s561_s10  ;;  %s140_s18 = scalar_lea.vmem (!%p131_p3), [#allocation4], %s271_s11 }
  0x25   : > { %437 = dma.done.wait (%p534_p8), %s137_s12, 128  }
  0x26   : > { %439 = vsyncadd (%p534_p8), %s137_s12, 4294967168  ;;  %s160_s19 = sld [smem:[#allocation3 + %s458_s16]]  ;;  %s274_s21 = sshll.u32 %s458_s16, 3  ;;  %v163_v0 = vld [vmem:[%s140_s18] sm:$0xff] }
  0x27   : > { %s179_s28 = scalar_lea.hbm %s610_s2, %s274_s21  ;;  %s159_s30 = scalar_lea.vmem [#allocation7], %s271_s11 }
  0x28   : > { %s181_s3 = sshll.u32 %s159_s30, 4  ;;  %s183_s5 = sshll.u32 %s179_s28, 4  ;;  %s182_s3 = int_to_ptr.vmem [resolvable:$true] %s181_s3  ;;  %s184_s5 = int_to_ptr.hbm [resolvable:$true] %s183_s5 }
  0x29   : > { %s168_s24 = scalar_lea.sflag [#allocation6], %s561_s10  ;;  %s396_s6 = sshra.s32 %s184_s5, 4  ;;  %s397_s6 = int_to_ptr.hbm [resolvable:$true] %s396_s6 }
  0x2a   : > { %s398_s16 = scalar_lea.hbm %s397_s6, 8  ;;  %s402_s9 = scalar_lea.hbm %s610_s2, 16 }
  0x2b   : > { %p399_p4 = scmp.ne.s32.totalorder %s397_s6, %s398_s16  ;;  %p403_p7 = scmp.lt.s32.totalorder %s397_s6, %s610_s2 }
  0x2c   : > { %s161_s29 = scvt.s32.f32 %s160_s19  ;;  %p404_p8 = scmp.lt.s32.totalorder %s402_s9, %s398_s16 }
  0x2d   : > { %p400_p5 = pnand %p399_p4, %p538_p9 }
  0x2e   : > { %s162_s4 = smul.f32 1.3333334, %s161_s29  ;;  %p405_p10 = por %p404_p8, %p403_p7 }
  0x2f   : > { %p401_p6 = pneg %p400_p5 }
  0x30   : > { %v164_v1 = vstv %s162_s4 }
  0x31   : > { %v165_v2 = vmul.f32 %v164_v1, %v163_v0  ;;  %p406_p13 = pnand %p405_p10, %p401_p6 }
  0x33   : > { %166 = vst [vmem:[%s159_s30] sm:$0xff] %v165_v2 }
  0x34   : > { %409 = shalt.err (!%p406_p13)
}
  0x35   : > { %279 = dma.vmem_to_hbm [thread:$0]  (%p538_p9), %s182_s3, 128, %s184_s5, %s168_s24  }
  0x36 PF: > { %s195_s10 = sand.u32 1, %s446_s13   ;;  %p286_p0 = pnand %p267_p12, %p545_p11 }
  0x37   : > { %s196_s18 = scalar_lea.sflag [#allocation6], %s195_s10 }
  0x38   : > { %p287_p1 = pneg %p286_p0 }
  0x3a   : > { %441 = dma.done.wait (%p287_p1), %s196_s18, 128  }
  0x3b   : > { %443 = vsyncadd (%p287_p1), %s196_s18, 4294967168  ;;  %s26_s0 = sadd.s32 1, %s466_s0   ;;  %s615_s13 = smov %s450_s14 }
  0x3c   : > { %p23_p2 = scmp.ge.s32.totalorder %s26_s0, 4   ;;  %s616_s14 = smov %s454_s15 }
  0x3d   : > { %s617_s15 = smov %s543_s26  ;;  %s618_s16 = smov %s462_s17 }
  0x3e   : > { %s619_s17 = smov %s621_s20  ;;  %25 = sbr.rel (!%p23_p2) target bundleno = 12 (0xc), region = 69 }
  0x43   :  { %202 = vsyncpa [#allocation5], 1 }
  0x44   :  { %204 = vsyncpa [#allocation5 + $0x1], 1 }
  0x45   :  { %205 = vsyncpa [#allocation6], 1 }
  0x46   :  { %207 = vsyncpa [#allocation6 + $0x1], 1 }

</bundles_post_ra>
